<compile_context>
chip_gen: v7x
topology: tpu7x:2x2x1
jax: 0.10.0
libtpu: 0.0.40
codegen_flags: <defaults>
</compile_context>

<pallas_src>
import functools

import jax
import jax.numpy as jnp
from jax.experimental import pallas as pl
from jax.experimental.pallas import tpu as pltpu

_LANES = 128


def mlp1_gemv_kernel(x_ref, w_ref, o_ref, *, kl):
    # x_ref: (TB, K) in VMEM   w_ref: (1, K) in VMEM   o_ref: (TB, 128)
    # Pure streaming VPU work: each 128-wide slice is a lane-tile-aligned
    # load; multiply by the matching weight slice (sublane broadcast of the
    # (1,128) row) and accumulate lane-chunk partial dot products.
    acc = (x_ref[:, 0:_LANES].astype(jnp.float32) *
           w_ref[:, 0:_LANES].astype(jnp.float32))
    for j in range(1, kl):
        lo = j * _LANES
        acc += (x_ref[:, lo:lo + _LANES].astype(jnp.float32) *
                w_ref[:, lo:lo + _LANES].astype(jnp.float32))
    # Lane-dense store: all 128 lanes live -> unmasked vst.
    o_ref[...] = acc.astype(o_ref.dtype)


def mlp1_forward(x_nchw, weight, bias):
    """Forward of MLP_1: flatten NCHW and apply fc1_1 = Linear(K, 1).

    x_nchw: (B, C, H, W) float32.  weight: (1, K) PyTorch layout.  bias: (1,).
    Returns (B, 1).
    """
    B = x_nchw.shape[0]
    K = 1
    for s in x_nchw.shape[1:]:
        K *= s
    x_flat = x_nchw.reshape(B, K)            # same as torch .view(-1, K)
    w_row = weight.reshape(1, K)             # natural lane-major layout

    # Pad K up to a multiple of 128 lanes (zeros don't change the dot product).
    kp = ((K + _LANES - 1) // _LANES) * _LANES
    if kp != K:
        # TODO(synk): padding costs one extra pass over x; only hit when
        # K % 128 != 0 (not the case for the 1x128x128 spec or this test).
        x_flat = jnp.pad(x_flat, ((0, 0), (0, kp - K)))
        w_row = jnp.pad(w_row, ((0, 0), (0, kp - K)))
    kl = kp // _LANES

    # Batch tile: biggest block whose double-buffered input (2 * TB * K * 4B)
    # stays well under the 32 MiB scoped-VMEM default (v7x-safe), capped at
    # the 512-1024 row sweet spot.  For the toy B=2 this is just the full batch.
    bytes_per_row = kp * 4
    tb_budget = max(8, (16 * 1024 * 1024) // (2 * bytes_per_row))
    tb_budget = max(8, min(1024, (tb_budget // 8) * 8))
    tb = B if B <= tb_budget else tb_budget
    grid = (pl.cdiv(B, tb),)

    partial = pl.pallas_call(
        functools.partial(mlp1_gemv_kernel, kl=kl),
        out_shape=jax.ShapeDtypeStruct((B, _LANES), jnp.float32),
        grid=grid,
        in_specs=[
            pl.BlockSpec((tb, kp), lambda i: (i, 0)),   # x: streamed over batch
            pl.BlockSpec((1, kp), lambda i: (0, 0)),    # w: resident, lane-major
        ],
        out_specs=pl.BlockSpec((tb, _LANES), lambda i: (i, 0)),
        compiler_params=pltpu.CompilerParams(
            dimension_semantics=("parallel",),          # 2 TCs split batch on v7x
        ),
    )(x_flat, w_row)

    # Finish: fold the 128 lane-chunk partials per row and add the bias as a
    # scalar broadcast (tiny op; avoids any in-kernel bias tile entirely).
    y = jnp.sum(partial, axis=-1, keepdims=True) + bias.astype(partial.dtype)
    return y.astype(x_nchw.dtype)


if __name__ == "__main__":
    # Small shapes consistent with the forward: NCHW input flattened to K.
    B, C, H, W = 2, 4, 16, 16
    K = C * H * W  # input_size = 1024

    key = jax.random.PRNGKey(0)
    kx, kw, kb = jax.random.split(key, 3)

    x = jax.random.normal(kx, (B, C, H, W), dtype=jnp.float32)

    # Deterministic PyTorch-style init for nn.Linear(K, 1):
    # weight, bias ~ U(-1/sqrt(K), 1/sqrt(K)).
    bound = 1.0 / (K ** 0.5)
    weight = jax.random.uniform(kw, (1, K), minval=-bound, maxval=bound,
                                dtype=jnp.float32)
    bias = jax.random.uniform(kb, (1,), minval=-bound, maxval=bound,
                              dtype=jnp.float32)

    y = mlp1_forward(x, weight, bias)
    y = jax.block_until_ready(y)

    # Full-precision reference (HIGHEST precision so the check is not polluted
    # by the default bf16 MXU pass).
    y_ref = (jnp.matmul(x.reshape(B, K), weight.T,
                        precision=jax.lax.Precision.HIGHEST) + bias)
    assert y.shape == (B, 1)
    assert jnp.allclose(y, y_ref, atol=1e-5, rtol=1e-5)

    print("KERNEL_OK")
</pallas_src>

<mosaic_0001>
module attributes {stable_mosaic.version = 11 : i64} {
  func.func @mlp1_gemv_kernel(%arg0: i32, %arg1: memref<2x1024xf32, #tpu.memory_space<vmem>>, %arg2: memref<1x1024xf32, #tpu.memory_space<vmem>>, %arg3: memref<2x128xf32, #tpu.memory_space<vmem>>) attributes {dimension_semantics = [#tpu.dimension_semantics<parallel>], iteration_bounds = array<i64: 1>, scalar_prefetch = 0 : i64, scratch_operands = 0 : i64, tpu.core_type = #tpu.core_type<tc>, window_params = [{transform_indices = @transform_0, window_bounds = array<i64: 2, 1024>}, {pipeline_mode = #tpu.pipeline_mode<synchronous>, transform_indices = @transform_1, window_bounds = array<i64: 1, 1024>}, {transform_indices = @transform_2, window_bounds = array<i64: 2, 128>}]} {
    %c0 = arith.constant 0 : index
    %c0_0 = arith.constant 0 : index
    %0 = vector.load %arg1[%c0, %c0_0] : memref<2x1024xf32, #tpu.memory_space<vmem>>, vector<2x128xf32>
    %c0_1 = arith.constant 0 : index
    %c0_2 = arith.constant 0 : index
    %1 = vector.load %arg2[%c0_1, %c0_2] : memref<1x1024xf32, #tpu.memory_space<vmem>>, vector<1x128xf32>
    %2 = vector.broadcast %1 : vector<1x128xf32> to vector<2x128xf32>
    %3 = arith.mulf %0, %2 : vector<2x128xf32>
    %c0_3 = arith.constant 0 : index
    %c128 = arith.constant 128 : index
    %4 = vector.load %arg1[%c0_3, %c128] : memref<2x1024xf32, #tpu.memory_space<vmem>>, vector<2x128xf32>
    %c0_4 = arith.constant 0 : index
    %c128_5 = arith.constant 128 : index
    %5 = vector.load %arg2[%c0_4, %c128_5] : memref<1x1024xf32, #tpu.memory_space<vmem>>, vector<1x128xf32>
    %6 = vector.broadcast %5 : vector<1x128xf32> to vector<2x128xf32>
    %7 = arith.mulf %4, %6 : vector<2x128xf32>
    %8 = arith.addf %3, %7 : vector<2x128xf32>
    %c0_6 = arith.constant 0 : index
    %c256 = arith.constant 256 : index
    %9 = vector.load %arg1[%c0_6, %c256] : memref<2x1024xf32, #tpu.memory_space<vmem>>, vector<2x128xf32>
    %c0_7 = arith.constant 0 : index
    %c256_8 = arith.constant 256 : index
    %10 = vector.load %arg2[%c0_7, %c256_8] : memref<1x1024xf32, #tpu.memory_space<vmem>>, vector<1x128xf32>
    %11 = vector.broadcast %10 : vector<1x128xf32> to vector<2x128xf32>
    %12 = arith.mulf %9, %11 : vector<2x128xf32>
    %13 = arith.addf %8, %12 : vector<2x128xf32>
    %c0_9 = arith.constant 0 : index
    %c384 = arith.constant 384 : index
    %14 = vector.load %arg1[%c0_9, %c384] : memref<2x1024xf32, #tpu.memory_space<vmem>>, vector<2x128xf32>
    %c0_10 = arith.constant 0 : index
    %c384_11 = arith.constant 384 : index
    %15 = vector.load %arg2[%c0_10, %c384_11] : memref<1x1024xf32, #tpu.memory_space<vmem>>, vector<1x128xf32>
    %16 = vector.broadcast %15 : vector<1x128xf32> to vector<2x128xf32>
    %17 = arith.mulf %14, %16 : vector<2x128xf32>
    %18 = arith.addf %13, %17 : vector<2x128xf32>
    %c0_12 = arith.constant 0 : index
    %c512 = arith.constant 512 : index
    %19 = vector.load %arg1[%c0_12, %c512] : memref<2x1024xf32, #tpu.memory_space<vmem>>, vector<2x128xf32>
    %c0_13 = arith.constant 0 : index
    %c512_14 = arith.constant 512 : index
    %20 = vector.load %arg2[%c0_13, %c512_14] : memref<1x1024xf32, #tpu.memory_space<vmem>>, vector<1x128xf32>
    %21 = vector.broadcast %20 : vector<1x128xf32> to vector<2x128xf32>
    %22 = arith.mulf %19, %21 : vector<2x128xf32>
    %23 = arith.addf %18, %22 : vector<2x128xf32>
    %c0_15 = arith.constant 0 : index
    %c640 = arith.constant 640 : index
    %24 = vector.load %arg1[%c0_15, %c640] : memref<2x1024xf32, #tpu.memory_space<vmem>>, vector<2x128xf32>
    %c0_16 = arith.constant 0 : index
    %c640_17 = arith.constant 640 : index
    %25 = vector.load %arg2[%c0_16, %c640_17] : memref<1x1024xf32, #tpu.memory_space<vmem>>, vector<1x128xf32>
    %26 = vector.broadcast %25 : vector<1x128xf32> to vector<2x128xf32>
    %27 = arith.mulf %24, %26 : vector<2x128xf32>
    %28 = arith.addf %23, %27 : vector<2x128xf32>
    %c0_18 = arith.constant 0 : index
    %c768 = arith.constant 768 : index
    %29 = vector.load %arg1[%c0_18, %c768] : memref<2x1024xf32, #tpu.memory_space<vmem>>, vector<2x128xf32>
    %c0_19 = arith.constant 0 : index
    %c768_20 = arith.constant 768 : index
    %30 = vector.load %arg2[%c0_19, %c768_20] : memref<1x1024xf32, #tpu.memory_space<vmem>>, vector<1x128xf32>
    %31 = vector.broadcast %30 : vector<1x128xf32> to vector<2x128xf32>
    %32 = arith.mulf %29, %31 : vector<2x128xf32>
    %33 = arith.addf %28, %32 : vector<2x128xf32>
    %c0_21 = arith.constant 0 : index
    %c896 = arith.constant 896 : index
    %34 = vector.load %arg1[%c0_21, %c896] : memref<2x1024xf32, #tpu.memory_space<vmem>>, vector<2x128xf32>
    %c0_22 = arith.constant 0 : index
    %c896_23 = arith.constant 896 : index
    %35 = vector.load %arg2[%c0_22, %c896_23] : memref<1x1024xf32, #tpu.memory_space<vmem>>, vector<1x128xf32>
    %36 = vector.broadcast %35 : vector<1x128xf32> to vector<2x128xf32>
    %37 = arith.mulf %34, %36 : vector<2x128xf32>
    %38 = arith.addf %33, %37 : vector<2x128xf32>
    %c0_24 = arith.constant 0 : index
    %c0_25 = arith.constant 0 : index
    %39 = vector.load %arg3[%c0_24, %c0_25] : memref<2x128xf32, #tpu.memory_space<vmem>>, vector<2x128xf32>
    tpu.vector_store %arg3[%c0_24, %c0_25], %38 {strides = array<i32>} : memref<2x128xf32, #tpu.memory_space<vmem>>, vector<2x128xf32>,
    return
  }
  func.func @transform_0(%arg0: i32) -> (i32, i32) {
    %c0_i32 = arith.constant 0 : i32
    %c0_i32_0 = arith.constant 0 : i32
    return %arg0, %c0_i32 : i32, i32
  }
  func.func @transform_1(%arg0: i32) -> (i32, i32) {
    %c0_i32 = arith.constant 0 : i32
    %c0_i32_0 = arith.constant 0 : i32
    %c0_i32_1 = arith.constant 0 : i32
    return %c0_i32, %c0_i32_0 : i32, i32
  }
  func.func @transform_2(%arg0: i32) -> (i32, i32) {
    %c0_i32 = arith.constant 0 : i32
    %c0_i32_0 = arith.constant 0 : i32
    return %arg0, %c0_i32 : i32, i32
  }
}

</mosaic_0001>

<bundles_post_ra>
// kernel: tpu_custom_call.1
= control target key start
LH: loop header
LB: loop body
LE: loop exit
PB: predicated region body
PF: predicated region fallthrough
CT: control target
= control target key end

     0   :  { %7 = vsyncpa [#allocation3], 0  ;;  %s269_s0 = inlined_call_operand.hbm [shape: f32[2,1024], index: 0, kind: input, shape index: {}]   ;;  %s270_s1 = inlined_call_operand.hbm [shape: f32[1,1024], index: 1, kind: input, shape index: {}]   ;;  %s271_s2 = inlined_call_operand.hbm [shape: f32[2,128], index: 2, kind: output, shape index: {}]  }
   0x1   :  { %8 = vsyncpa [#allocation6], 0 }
   0x2   :  { %9 = vsyncpa [#allocation4], 0  ;;  %s215_s9 = smov [#allocation2]   ;;  %s216_s11 = smov [#allocation5]  }
   0x3   :  { %s16_s10 = sshll.u32 %s215_s9, 4  ;;  %s26_s12 = sshll.u32 %s216_s11, 4  ;;  %s17_s10 = int_to_ptr.vmem [resolvable:$true] %s16_s10  ;;  %s27_s12 = int_to_ptr.vmem [resolvable:$true] %s26_s12 }
   0x4   :  { %s143_s15 = scalar_lea.hbm %s269_s0, 256 }
   0x5   :  { %p144_p0 = scmp.ne.s32.totalorder %s269_s0, %s143_s15  ;;  %p147_p1 = scmp.lt.u32.totalorder %s143_s15, %s269_s0 }
   0x7   :  { %p149_p2 = pnand %p147_p1, %p144_p0 }
   0x9   :  { %152 = shalt.err (!%p149_p2)
}
   0xa   :  { %s153_s20 = scalar_lea.vmem %s17_s10, 256  ;;  %p158_p4 = scmp.lt.s32.totalorder %s17_s10, %s17_s10 }
   0xb   :  { %p154_p3 = scmp.ne.s32.totalorder %s17_s10, %s153_s20  ;;  %p159_p5 = scmp.lt.s32.totalorder %s153_s20, %s153_s20 }
   0xd   :  { %p160_p6 = por %p159_p5, %p158_p4 }
   0xf   :  { %p161_p7 = pnand %p160_p6, %p154_p3 }
  0x11   :  { %164 = shalt.err (!%p161_p7)
}
  0x12   :  { %19 = dma.hbm_to_vmem [thread:$0]  %s269_s0, 256, %s17_s10, [#allocation3]  }
  0x13   :  { %s165_s25 = scalar_lea.hbm %s270_s1, 128 }
  0x14   :  { %p166_p8 = scmp.ne.s32.totalorder %s270_s1, %s165_s25  ;;  %p169_p9 = scmp.lt.u32.totalorder %s165_s25, %s270_s1 }
  0x16   :  { %p171_p10 = pnand %p169_p9, %p166_p8 }
  0x18   :  { %174 = shalt.err (!%p171_p10)
}
  0x19   :  { %s175_s30 = scalar_lea.vmem %s27_s12, 128  ;;  %p180_p12 = scmp.lt.s32.totalorder %s27_s12, %s27_s12 }
  0x1a   :  { %p176_p11 = scmp.ne.s32.totalorder %s27_s12, %s175_s30  ;;  %p181_p13 = scmp.lt.s32.totalorder %s175_s30, %s175_s30 }
  0x1c   :  { %p182_p0 = por %p181_p13, %p180_p12 }
  0x1e   :  { %p183_p1 = pnand %p182_p0, %p176_p11 }
  0x20   :  { %186 = shalt.err (!%p183_p1)
}
  0x21   :  { %29 = dma.hbm_to_vmem [thread:$0]  %s270_s1, 128, %s27_s12, [#allocation6]  }
  0x22   :  { %209 = dma.done.wait [#allocation3], 256  }
  0x23   :  { %210 = vsyncadd [#allocation3], 4294967040 }
  0x24   :  { %211 = dma.done.wait [#allocation6], 128  }
  0x25   :  { %212 = vsyncadd [#allocation6], 4294967168  ;;  %v36_v0 = vld [vmem:[#allocation2] sm:$0x3]  ;;  %v132_v1 = vld [vmem:[#allocation5] ss:$0 sm:$0xff] }
  0x26   :  { %v45_v2 = vld [vmem:[#allocation2 + $0x2] sm:$0x3]  ;;  %v44_v3 = vmul.f32 %v132_v1, %v36_v0  ;;  %v133_v4 = vld [vmem:[#allocation5 + $0x1] ss:$0 sm:$0xff]  ;;  %v55_v5 = vld [vmem:[#allocation2 + $0x4] sm:$0x3] }
  0x27   :  { %v134_v6 = vld [vmem:[#allocation5 + $0x2] ss:$0 sm:$0xff]  ;;  %v53_v7 = vmul.f32 %v133_v4, %v45_v2  ;;  %v65_v9 = vld [vmem:[#allocation2 + $0x6] sm:$0x3]  ;;  %v135_v10 = vld [vmem:[#allocation5 + $0x3] ss:$0 sm:$0xff] }
  0x28   :  { %v63_v8 = vmul.f32 %v134_v6, %v55_v5  ;;  %v75_v11 = vld [vmem:[#allocation2 + $0x8] sm:$0x3]  ;;  %v136_v12 = vld [vmem:[#allocation5 + $0x4] ss:$0 sm:$0xff]  ;;  %v73_v14 = vmul.f32 %v135_v10, %v65_v9  ;;  %v85_v15 = vld [vmem:[#allocation2 + $0xa] sm:$0x3] }
  0x29   :  { %v54_v13 = vadd.f32 %v53_v7, %v44_v3  ;;  %v137_v16 = vld [vmem:[#allocation5 + $0x5] ss:$0 sm:$0xff]  ;;  %v83_v18 = vmul.f32 %v136_v12, %v75_v11  ;;  %v95_v19 = vld [vmem:[#allocation2 + $0xc] sm:$0x3]  ;;  %v138_v20 = vld [vmem:[#allocation5 + $0x6] ss:$0 sm:$0xff] }
  0x2a   :  { %v93_v22 = vmul.f32 %v137_v16, %v85_v15  ;;  %v105_v23 = vld [vmem:[#allocation2 + $0xe] sm:$0x3]  ;;  %v139_v24 = vld [vmem:[#allocation5 + $0x7] ss:$0 sm:$0xff]  ;;  %v103_v26 = vmul.f32 %v138_v20, %v95_v19  ;;  %s217_s1 = smov [#allocation7]  }
  0x2b   :  { %v64_v17 = vadd.f32 %v63_v8, %v54_v13  ;;  %v113_v28 = vmul.f32 %v139_v24, %v105_v23  ;;  %s122_s4 = sshll.u32 %s217_s1, 4  ;;  %s123_s4 = int_to_ptr.vmem [resolvable:$true] %s122_s4 }
  0x2c   :  { %s187_s5 = scalar_lea.vmem %s123_s4, 32  ;;  %p192_p3 = scmp.lt.s32.totalorder %s123_s4, %s123_s4 }
  0x2d   :  { %v74_v21 = vadd.f32 %v73_v14, %v64_v17  ;;  %p188_p2 = scmp.ne.s32.totalorder %s123_s4, %s187_s5  ;;  %p193_p4 = scmp.lt.s32.totalorder %s187_s5, %s187_s5 }
  0x2f   :  { %v84_v25 = vadd.f32 %v83_v18, %v74_v21  ;;  %p194_p5 = por %p193_p4, %p192_p3 }
  0x31   :  { %v94_v27 = vadd.f32 %v93_v22, %v84_v25  ;;  %p195_p6 = pnand %p194_p5, %p188_p2 }
  0x33   :  { %v104_v29 = vadd.f32 %v103_v26, %v94_v27 }
  0x35   :  { %v114_v30 = vadd.f32 %v113_v28, %v104_v29 }
  0x37   :  { %115 = vst [vmem:[#allocation7] sm:$0x3] %v114_v30 }
  0x38   :  { %198 = shalt.err (!%p195_p6)
}
  0x39   :  { %s199_s8 = scalar_lea.hbm %s271_s2, 32 }
  0x3a   :  { %p200_p7 = scmp.ne.s32.totalorder %s271_s2, %s199_s8  ;;  %p203_p8 = scmp.lt.u32.totalorder %s199_s8, %s271_s2 }
  0x3c   :  { %p205_p9 = pnand %p203_p8, %p200_p7 }
  0x3e   :  { %208 = shalt.err (!%p205_p9)
}
  0x3f   :  { %125 = dma.vmem_to_hbm [thread:$0]  %s123_s4, 32, %s271_s2, [#allocation4]  }
  0x40   :  { %213 = dma.done.wait [#allocation4], 32  }
  0x41   :  { %214 = vsyncadd [#allocation4], 4294967264 }
  0x42   :  { %129 = vsyncpa [#allocation3], 1 }
  0x43   :  { %130 = vsyncpa [#allocation6], 1 }
  0x44   :  { %131 = vsyncpa [#allocation4], 1 }

</bundles_post_ra>
